<compile_context>
chip_gen: v7x
topology: tpu7x:2x2x1
jax: 0.10.0
libtpu: 0.0.40
codegen_flags: <defaults>
</compile_context>

<pallas_src>
import jax
import jax.numpy as jnp
import numpy as np
from jax.experimental import pallas as pl
from jax.experimental.pallas import tpu as pltpu

HIDDEN = 32
NUM_HEADS = 4          # head_dim = 8; the head split cancels exactly for seq_len == 1
BATCH = 8
EPS = 1e-5             # PyTorch nn.LayerNorm default

# Packed slab geometry (rows = sublanes, cols = lanes).
SLAB_ROWS = 4 * HIDDEN + 8      # 128 weight rows + one 8-row bias tile = 136
SLAB_COLS = 128                 # lane-dense last dim


def residual_block_kernel(x_ref, s_ref, o_ref):
    H = HIDDEN
    x = x_ref[...]                                   # (B, H) f32

    # ---- static, lane-0-aligned views into the packed slab ------------------
    w_res = s_ref[0:H,       0:H]                    # I + Wv@Wo            (H, H)
    w1    = s_ref[H:2 * H,   0:2 * H]                # FFN first linear^T   (H, 2H)
    w2    = s_ref[2 * H:4 * H, 0:H]                  # FFN second linear^T  (2H, H)

    r = 4 * H                                        # bias tile (one (8,128) vreg)
    b_attn = s_ref[r + 0:r + 1, 0:H]
    g1     = s_ref[r + 1:r + 2, 0:H]
    be1    = s_ref[r + 2:r + 3, 0:H]
    g2     = s_ref[r + 3:r + 4, 0:H]
    b1     = s_ref[r + 4:r + 5, 0:2 * H]
    b2     = s_ref[r + 5:r + 6, 0:H]
    be2    = s_ref[r + 6:r + 7, 0:H]

    def layernorm(z, g, b):
        # Two-pass mean/variance (PyTorch-equivalent, no catastrophic cancellation).
        mu = jnp.mean(z, axis=-1, keepdims=True)
        zc = z - mu
        var = jnp.mean(zc * zc, axis=-1, keepdims=True)
        return zc * jax.lax.rsqrt(var + EPS) * g + b

    # ---- x + MHA(x): softmax over one key == 1 -> one fused matmul ----------
    x1 = jnp.dot(x, w_res, preferred_element_type=jnp.float32) + b_attn
    xn1 = layernorm(x1, g1, be1)

    # ---- FFN: Linear(H, 2H) -> ReLU -> Linear(2H, H), + residual + LN2 ------
    h = jnp.maximum(jnp.dot(xn1, w1, preferred_element_type=jnp.float32) + b1, 0.0)
    x2 = xn1 + jnp.dot(h, w2, preferred_element_type=jnp.float32) + b2
    o_ref[...] = layernorm(x2, g2, be2)


def residual_block(x, slab):
    """ResidualBlock forward in one grid-less Pallas call (x + one packed slab, all in VMEM)."""
    B, H = x.shape
    return pl.pallas_call(
        residual_block_kernel,
        out_shape=jax.ShapeDtypeStruct((B, H), jnp.float32),
        in_specs=[
            pl.BlockSpec(memory_space=pltpu.MemorySpace.VMEM),
            pl.BlockSpec(memory_space=pltpu.MemorySpace.VMEM),
        ],
        out_specs=pl.BlockSpec(memory_space=pltpu.MemorySpace.VMEM),
    )(x, slab)


def init_raw_params(key, hidden):
    """Synthetic parameters in native PyTorch layouts (MultiheadAttention / Linear / LayerNorm)."""
    ks = jax.random.split(key, 8)
    in_proj_w = jax.random.normal(ks[0], (3 * hidden, hidden), jnp.float32) * 0.1
    in_proj_b = jax.random.normal(ks[1], (3 * hidden,), jnp.float32) * 0.1
    out_proj_w = jax.random.normal(ks[2], (hidden, hidden), jnp.float32) * 0.1
    out_proj_b = jax.random.normal(ks[3], (hidden,), jnp.float32) * 0.1
    w1 = jax.random.normal(ks[4], (2 * hidden, hidden), jnp.float32) * 0.1
    b1 = jax.random.normal(ks[5], (2 * hidden,), jnp.float32) * 0.1
    w2 = jax.random.normal(ks[6], (hidden, 2 * hidden), jnp.float32) * 0.1
    b2 = jax.random.normal(ks[7], (hidden,), jnp.float32) * 0.1
    g1, be1 = jnp.ones((hidden,), jnp.float32), jnp.zeros((hidden,), jnp.float32)
    g2, be2 = jnp.ones((hidden,), jnp.float32), jnp.zeros((hidden,), jnp.float32)
    return (in_proj_w, in_proj_b, out_proj_w, out_proj_b,
            w1, b1, w2, b2, g1, be1, g2, be2)


def pack_params(raw, hidden):
    """Fold the linear attention path and pack every operand into ONE lane-0-aligned slab."""
    (in_proj_w, in_proj_b, out_proj_w, out_proj_b,
     w1, b1, w2, b2, g1, be1, g2, be2) = raw
    H = hidden

    wv = in_proj_w[2 * H:].T                 # (H, H) so that v = x @ wv + bv
    bv = in_proj_b[2 * H:]
    wo = out_proj_w.T                        # (H, H) so that out = v @ wo + bo

    # Fused, exact: attn(x) = x @ (wv@wo) + (bv@wo + bo); fold the residual identity too.
    w_res = jnp.eye(H, dtype=jnp.float32) + wv @ wo
    b_attn = bv @ wo + out_proj_b

    slab = jnp.zeros((SLAB_ROWS, SLAB_COLS), jnp.float32)
    # Weight blocks stacked along sublanes, each starting at lane 0.
    slab = slab.at[0:H,         0:H].set(w_res)
    slab = slab.at[H:2 * H,     0:2 * H].set(w1.T)
    slab = slab.at[2 * H:4 * H, 0:H].set(w2.T)
    # Bias / LayerNorm tile: one (8, 128) vreg, one vector per row, lane 0 aligned.
    r = 4 * H
    slab = slab.at[r + 0, 0:H].set(b_attn)
    slab = slab.at[r + 1, 0:H].set(g1)
    slab = slab.at[r + 2, 0:H].set(be1)
    slab = slab.at[r + 3, 0:H].set(g2)
    slab = slab.at[r + 4, 0:2 * H].set(b1)
    slab = slab.at[r + 5, 0:H].set(b2)
    slab = slab.at[r + 6, 0:H].set(be2)
    return slab


def reference(x, raw):
    """Pure-JAX reference of the PyTorch forward pass (seq_len == 1), from the raw params."""
    (in_proj_w, in_proj_b, out_proj_w, out_proj_b,
     w1, b1, w2, b2, g1, be1, g2, be2) = raw
    B, H = x.shape
    hd = H // NUM_HEADS

    def ln(z, g, b):
        mu = z.mean(-1, keepdims=True)
        var = ((z - mu) ** 2).mean(-1, keepdims=True)
        return (z - mu) / jnp.sqrt(var + EPS) * g + b

    wq, wk, wv = in_proj_w[:H], in_proj_w[H:2 * H], in_proj_w[2 * H:]
    bq, bk, bv = in_proj_b[:H], in_proj_b[H:2 * H], in_proj_b[2 * H:]
    q = (x @ wq.T + bq).reshape(B, NUM_HEADS, hd)
    k = (x @ wk.T + bk).reshape(B, NUM_HEADS, hd)
    v = (x @ wv.T + bv).reshape(B, NUM_HEADS, hd)
    scores = jnp.sum(q * k, axis=-1, keepdims=True) / jnp.sqrt(jnp.float32(hd))  # (B, nh, 1)
    weights = jax.nn.softmax(scores, axis=-1)                                    # == 1.0 exactly
    ctx = (weights * v).reshape(B, H)
    attn_out = ctx @ out_proj_w.T + out_proj_b

    x1 = ln(x + attn_out, g1, be1)
    ffn = jnp.maximum(x1 @ w1.T + b1, 0.0) @ w2.T + b2
    return ln(x1 + ffn, g2, be2)


if __name__ == "__main__":
    key = jax.random.PRNGKey(0)
    kx, kp = jax.random.split(key)
    x = jax.random.normal(kx, (BATCH, HIDDEN), jnp.float32)

    raw = init_raw_params(kp, HIDDEN)
    slab = pack_params(raw, HIDDEN)

    out = jax.block_until_ready(residual_block(x, slab))

    ref = reference(x, raw)
    np.testing.assert_allclose(np.asarray(out), np.asarray(ref), rtol=1e-3, atol=1e-3)
    print("KERNEL_OK")
</pallas_src>

<mosaic_0001>
module attributes {stable_mosaic.version = 11 : i64} {
  func.func @residual_block_kernel(%arg0: memref<8x32xf32, #tpu.memory_space<vmem>>, %arg1: memref<136x128xf32, #tpu.memory_space<vmem>>, %arg2: memref<8x32xf32, #tpu.memory_space<vmem>>) attributes {dimension_semantics = [], scalar_prefetch = 0 : i64, scratch_operands = 0 : i64, tpu.core_type = #tpu.core_type<tc>} {
    %c0 = arith.constant 0 : index
    %c0_0 = arith.constant 0 : index
    %0 = vector.load %arg0[%c0, %c0_0] : memref<8x32xf32, #tpu.memory_space<vmem>>, vector<8x32xf32>
    %c0_1 = arith.constant 0 : index
    %c0_2 = arith.constant 0 : index
    %1 = vector.load %arg1[%c0_1, %c0_2] : memref<136x128xf32, #tpu.memory_space<vmem>>, vector<32x32xf32>
    %c32 = arith.constant 32 : index
    %c0_3 = arith.constant 0 : index
    %2 = vector.load %arg1[%c32, %c0_3] : memref<136x128xf32, #tpu.memory_space<vmem>>, vector<32x64xf32>
    %c64 = arith.constant 64 : index
    %c0_4 = arith.constant 0 : index
    %3 = vector.load %arg1[%c64, %c0_4] : memref<136x128xf32, #tpu.memory_space<vmem>>, vector<64x32xf32>
    %c128 = arith.constant 128 : index
    %c0_5 = arith.constant 0 : index
    %4 = vector.load %arg1[%c128, %c0_5] : memref<136x128xf32, #tpu.memory_space<vmem>>, vector<1x32xf32>
    %c129 = arith.constant 129 : index
    %c0_6 = arith.constant 0 : index
    %5 = vector.load %arg1[%c129, %c0_6] : memref<136x128xf32, #tpu.memory_space<vmem>>, vector<1x32xf32>
    %c130 = arith.constant 130 : index
    %c0_7 = arith.constant 0 : index
    %6 = vector.load %arg1[%c130, %c0_7] : memref<136x128xf32, #tpu.memory_space<vmem>>, vector<1x32xf32>
    %c131 = arith.constant 131 : index
    %c0_8 = arith.constant 0 : index
    %7 = vector.load %arg1[%c131, %c0_8] : memref<136x128xf32, #tpu.memory_space<vmem>>, vector<1x32xf32>
    %c132 = arith.constant 132 : index
    %c0_9 = arith.constant 0 : index
    %8 = vector.load %arg1[%c132, %c0_9] : memref<136x128xf32, #tpu.memory_space<vmem>>, vector<1x64xf32>
    %c133 = arith.constant 133 : index
    %c0_10 = arith.constant 0 : index
    %9 = vector.load %arg1[%c133, %c0_10] : memref<136x128xf32, #tpu.memory_space<vmem>>, vector<1x32xf32>
    %c134 = arith.constant 134 : index
    %c0_11 = arith.constant 0 : index
    %10 = vector.load %arg1[%c134, %c0_11] : memref<136x128xf32, #tpu.memory_space<vmem>>, vector<1x32xf32>
    %cst = arith.constant dense<0.000000e+00> : vector<8x32xf32>
    %11 = tpu.matmul %0, %1, %cst {dimension_numbers = #tpu.dot_dimension_numbers<[1], [0], [0], [1], [0, 0, 1, 1], [], []>} : vector<8x32xf32>, vector<32x32xf32>, vector<8x32xf32> -> vector<8x32xf32>
    %12 = vector.broadcast %4 : vector<1x32xf32> to vector<8x32xf32>
    %13 = arith.addf %11, %12 : vector<8x32xf32>
    %cst_12 = arith.constant dense<0.000000e+00> : vector<8xf32>
    %14 = vector.multi_reduction <add>, %13, %cst_12 [1] : vector<8x32xf32> to vector<8xf32>
    %15 = vector.shape_cast %14 : vector<8xf32> to vector<8x1xf32>
    %cst_13 = arith.constant 3.200000e+01 : f32
    %16 = vector.broadcast %cst_13 : f32 to vector<8x1xf32>
    %17 = arith.divf %15, %16 : vector<8x1xf32>
    %18 = vector.broadcast %17 : vector<8x1xf32> to vector<8x32xf32>
    %19 = arith.subf %13, %18 : vector<8x32xf32>
    %20 = arith.mulf %19, %19 : vector<8x32xf32>
    %cst_14 = arith.constant dense<0.000000e+00> : vector<8xf32>
    %21 = vector.multi_reduction <add>, %20, %cst_14 [1] : vector<8x32xf32> to vector<8xf32>
    %22 = vector.shape_cast %21 : vector<8xf32> to vector<8x1xf32>
    %cst_15 = arith.constant 3.200000e+01 : f32
    %23 = vector.broadcast %cst_15 : f32 to vector<8x1xf32>
    %24 = arith.divf %22, %23 : vector<8x1xf32>
    %cst_16 = arith.constant 9.99999974E-6 : f32
    %25 = vector.broadcast %cst_16 : f32 to vector<8x1xf32>
    %26 = arith.addf %24, %25 : vector<8x1xf32>
    %27 = math.rsqrt %26 : vector<8x1xf32>
    %28 = vector.broadcast %27 : vector<8x1xf32> to vector<8x32xf32>
    %29 = arith.mulf %19, %28 : vector<8x32xf32>
    %30 = vector.broadcast %5 : vector<1x32xf32> to vector<8x32xf32>
    %31 = arith.mulf %29, %30 : vector<8x32xf32>
    %32 = vector.broadcast %6 : vector<1x32xf32> to vector<8x32xf32>
    %33 = arith.addf %31, %32 : vector<8x32xf32>
    %cst_17 = arith.constant dense<0.000000e+00> : vector<8x64xf32>
    %34 = tpu.matmul %33, %2, %cst_17 {dimension_numbers = #tpu.dot_dimension_numbers<[1], [0], [0], [1], [0, 0, 1, 1], [], []>} : vector<8x32xf32>, vector<32x64xf32>, vector<8x64xf32> -> vector<8x64xf32>
    %35 = vector.broadcast %8 : vector<1x64xf32> to vector<8x64xf32>
    %36 = arith.addf %34, %35 : vector<8x64xf32>
    %cst_18 = arith.constant 0.000000e+00 : f32
    %37 = vector.broadcast %cst_18 : f32 to vector<8x64xf32>
    %38 = arith.maximumf %36, %37 : vector<8x64xf32>
    %cst_19 = arith.constant dense<0.000000e+00> : vector<8x32xf32>
    %39 = tpu.matmul %38, %3, %cst_19 {dimension_numbers = #tpu.dot_dimension_numbers<[1], [0], [0], [1], [0, 0, 1, 1], [], []>} : vector<8x64xf32>, vector<64x32xf32>, vector<8x32xf32> -> vector<8x32xf32>
    %40 = arith.addf %33, %39 : vector<8x32xf32>
    %41 = vector.broadcast %9 : vector<1x32xf32> to vector<8x32xf32>
    %42 = arith.addf %40, %41 : vector<8x32xf32>
    %cst_20 = arith.constant dense<0.000000e+00> : vector<8xf32>
    %43 = vector.multi_reduction <add>, %42, %cst_20 [1] : vector<8x32xf32> to vector<8xf32>
    %44 = vector.shape_cast %43 : vector<8xf32> to vector<8x1xf32>
    %cst_21 = arith.constant 3.200000e+01 : f32
    %45 = vector.broadcast %cst_21 : f32 to vector<8x1xf32>
    %46 = arith.divf %44, %45 : vector<8x1xf32>
    %47 = vector.broadcast %46 : vector<8x1xf32> to vector<8x32xf32>
    %48 = arith.subf %42, %47 : vector<8x32xf32>
    %49 = arith.mulf %48, %48 : vector<8x32xf32>
    %cst_22 = arith.constant dense<0.000000e+00> : vector<8xf32>
    %50 = vector.multi_reduction <add>, %49, %cst_22 [1] : vector<8x32xf32> to vector<8xf32>
    %51 = vector.shape_cast %50 : vector<8xf32> to vector<8x1xf32>
    %cst_23 = arith.constant 3.200000e+01 : f32
    %52 = vector.broadcast %cst_23 : f32 to vector<8x1xf32>
    %53 = arith.divf %51, %52 : vector<8x1xf32>
    %cst_24 = arith.constant 9.99999974E-6 : f32
    %54 = vector.broadcast %cst_24 : f32 to vector<8x1xf32>
    %55 = arith.addf %53, %54 : vector<8x1xf32>
    %56 = math.rsqrt %55 : vector<8x1xf32>
    %57 = vector.broadcast %56 : vector<8x1xf32> to vector<8x32xf32>
    %58 = arith.mulf %48, %57 : vector<8x32xf32>
    %59 = vector.broadcast %7 : vector<1x32xf32> to vector<8x32xf32>
    %60 = arith.mulf %58, %59 : vector<8x32xf32>
    %61 = vector.broadcast %10 : vector<1x32xf32> to vector<8x32xf32>
    %62 = arith.addf %60, %61 : vector<8x32xf32>
    %c0_25 = arith.constant 0 : index
    %c0_26 = arith.constant 0 : index
    %63 = vector.load %arg2[%c0_25, %c0_26] : memref<8x32xf32, #tpu.memory_space<vmem>>, vector<8x32xf32>
    tpu.vector_store %arg2[%c0_25, %c0_26], %62 {strides = array<i32>} : memref<8x32xf32, #tpu.memory_space<vmem>>, vector<8x32xf32>,
    return
  }
}

</mosaic_0001>

<bundles_post_ra>
// kernel: tpu_custom_call.1
= control target key start
LH: loop header
LB: loop body
LE: loop exit
PB: predicated region body
PF: predicated region fallthrough
CT: control target
= control target key end

     0   :  { %7 = vsyncpa [#allocation3], 0  ;;  %s616_s0 = inlined_call_operand.hbm [shape: f32[8,32], index: 0, kind: input, shape index: {}]   ;;  %s617_s1 = inlined_call_operand.hbm [shape: f32[136,128], index: 1, kind: input, shape index: {}]   ;;  %s618_s2 = inlined_call_operand.hbm [shape: f32[8,32], index: 2, kind: output, shape index: {}]  }
   0x1   :  { %8 = vsyncpa [#allocation6], 0 }
   0x2   :  { %9 = vsyncpa [#allocation4], 0  ;;  %s540_s9 = smov [#allocation2]   ;;  %s541_s11 = smov [#allocation5]  }
   0x3   :  { %s16_s10 = sshll.u32 %s540_s9, 4  ;;  %s25_s12 = sshll.u32 %s541_s11, 4  ;;  %s17_s10 = int_to_ptr.vmem [resolvable:$true] %s16_s10  ;;  %s563_s12 = int_to_ptr.vmem [resolvable:$true] %s25_s12 }
   0x4   :  { %s468_s15 = scalar_lea.hbm %s616_s0, 128 }
   0x5   :  { %p469_p0 = scmp.ne.s32.totalorder %s616_s0, %s468_s15  ;;  %p472_p1 = scmp.lt.u32.totalorder %s468_s15, %s616_s0 }
   0x7   :  { %p474_p2 = pnand %p472_p1, %p469_p0 }
   0x9   :  { %477 = shalt.err (!%p474_p2)
}
   0xa   :  { %s478_s20 = scalar_lea.vmem %s17_s10, 128  ;;  %p483_p4 = scmp.lt.s32.totalorder %s17_s10, %s17_s10 }
   0xb   :  { %p479_p3 = scmp.ne.s32.totalorder %s17_s10, %s478_s20  ;;  %p484_p5 = scmp.lt.s32.totalorder %s478_s20, %s478_s20 }
   0xd   :  { %p485_p6 = por %p484_p5, %p483_p4 }
   0xf   :  { %p486_p7 = pnand %p485_p6, %p479_p3 }
  0x11   :  { %489 = shalt.err (!%p486_p7)
}
  0x12   :  { %19 = dma.hbm_to_vmem [thread:$0]  %s616_s0, 128, %s17_s10, [#allocation3]  }
  0x13   :  { %s490_s25 = scalar_lea.hbm %s617_s1, 2176 }
  0x14   :  { %p491_p8 = scmp.ne.s32.totalorder %s617_s1, %s490_s25  ;;  %p494_p9 = scmp.lt.u32.totalorder %s490_s25, %s617_s1 }
  0x16   :  { %p496_p10 = pnand %p494_p9, %p491_p8 }
  0x18   :  { %499 = shalt.err (!%p496_p10)
}
  0x19   :  { %s500_s30 = scalar_lea.vmem %s563_s12, 2176  ;;  %p505_p12 = scmp.lt.s32.totalorder %s563_s12, %s563_s12 }
  0x1a   :  { %p501_p11 = scmp.ne.s32.totalorder %s563_s12, %s500_s30  ;;  %p506_p13 = scmp.lt.s32.totalorder %s500_s30, %s500_s30 }
  0x1c   :  { %p507_p0 = por %p506_p13, %p505_p12 }
  0x1e   :  { %p508_p1 = pnand %p507_p0, %p501_p11 }
  0x20   :  { %511 = shalt.err (!%p508_p1)
}
  0x21   :  { %s542_s0 = smov 128   ;;  %s543_s3 = smov 8  }
  0x22   :  { %31 = dma.hbm_to_vmem [thread:$0]  %s617_s1, 2176, %s563_s12, [#allocation6], %s542_s0, %s542_s0, %s543_s3  }
  0x23   :  { %534 = dma.done.wait [#allocation3], 128  }
  0x24   :  { %535 = vsyncadd [#allocation3], 4294967168 }
  0x25   :  { %536 = dma.done.wait [#allocation6], 2176  }
  0x26   :  { %537 = vsyncadd [#allocation6], 4294965120  ;;  %v544_v0 = vmov 0.0|0.0   ;;  %vm545_vm0 = vmmov 0   ;;  %v546_v1 = vmov 0.0   ;;  %v39_v2 = vld [vmem:[#allocation5] sm:$0xff] }
  0x27   :  { %432 = vmatprep.subr.bf16.mxu1 %v544_v0  ;;  %399 = vmatprep.mubr.msk.f32.mxu1 %vm545_vm0, %v546_v1  ;;  %v40_v3 = vld [vmem:[#allocation5 + $0x8] sm:$0xff]  ;;  %v41_v4 = vld [vmem:[#allocation5 + $0x10] sm:$0xff]  ;;  %v42_v6 = vld [vmem:[#allocation5 + $0x18] sm:$0xff]  ;;  %vm66_vm1 = vcmask 261120   ;;  %vm242_vm2 = vcmask 523264   ;;  %s547_s1 = smov [#allocation7]  }
  0x28   :  { %444 = vmatprep.subr.bf16.mxu0 %v544_v0  ;;  %429 = vmatprep.mubr.msk.f32.mxu0 %vm545_vm0, %v546_v1  ;;  %v433_v5 = vpack.c.bf16 %v40_v3, %v39_v2  ;;  %v436_v7 = vpack.c.bf16 %v42_v6, %v41_v4  ;;  %v38_v8 = vld [vmem:[#allocation2] sm:$0xff]  ;;  %v362_v9 = vld [vmem:[#allocation5 + $0x80] ss:$0 sm:$0xff]  ;;  %v44_v20 = vld [vmem:[#allocation5 + $0x28] sm:$0xff]  ;;  %s352_s6 = sshll.u32 %s547_s1, 4  ;;  %s353_s6 = int_to_ptr.vmem [resolvable:$true] %s352_s6 }
  0x29   :  { %v43_v19 = vld [vmem:[#allocation5 + $0x20] sm:$0xff]  ;;  %v45_v22 = vld [vmem:[#allocation5 + $0x30] sm:$0xff]  ;;  %v46_v23 = vld [vmem:[#allocation5 + $0x38] sm:$0xff]  ;;  %s512_s7 = scalar_lea.vmem %s353_s6, 128  ;;  %p517_p3 = scmp.lt.s32.totalorder %s353_s6, %s353_s6 }
  0x2a   :  { %434 = vmatpush3.bf16.msra.mxu1 %v433_v5  ;;  %v439_v21 = vpack.c.bf16 %v44_v20, %v43_v19  ;;  %v442_v24 = vpack.c.bf16 %v46_v23, %v45_v22  ;;  %v47_v25 = vld [vmem:[#allocation5 + $0x40] sm:$0xff]  ;;  %v48_v26 = vld [vmem:[#allocation5 + $0x48] sm:$0xff]  ;;  %v49_v27 = vld [vmem:[#allocation5 + $0x50] sm:$0xff]  ;;  %p513_p2 = scmp.ne.s32.totalorder %s353_s6, %s512_s7  ;;  %p518_p4 = scmp.lt.s32.totalorder %s512_s7, %s512_s7 }
  0x2b   :  { %435 = vmatprep.subr.bf16.mxu1 %v544_v0  ;;  %v445_v28 = vpack.c.bf16 %v48_v26, %v47_v25  ;;  %v50_v29 = vld [vmem:[#allocation5 + $0x58] sm:$0xff]  ;;  %v51_v31 = vld [vmem:[#allocation5 + $0x60] sm:$0xff]  ;;  %v52_v32 = vld [vmem:[#allocation5 + $0x68] sm:$0xff] }
  0x2c   :  { %v448_v30 = vpack.c.bf16 %v50_v29, %v49_v27  ;;  %v451_v33 = vpack.c.bf16 %v52_v32, %v51_v31  ;;  %v364_v38 = vld [vmem:[#allocation5 + $0x81] ss:$0 sm:$0xff]  ;;  %v365_v40 = vld [vmem:[#allocation5 + $0x82] ss:$0 sm:$0xff]  ;;  %v53_v43 = vld [vmem:[#allocation5 + $0x70] sm:$0xff]  ;;  %p519_p5 = por %p518_p4, %p517_p3 }
  0x2d   :  { %446 = vmatpush3.bf16.msra.mxu0 %v445_v28  ;;  %v54_v44 = vld [vmem:[#allocation5 + $0x78] sm:$0xff]  ;;  %v366_v46 = vld [vmem:[#allocation5 + $0x84] ss:$0 sm:$0xff]  ;;  %v369_v52 = vld [vmem:[#allocation5 + $0x85] ss:$0 sm:$0xff] }
  0x2e   :  { %437 = vmatpush3.bf16.msra.mxu1 %v436_v7  ;;  %447 = vmatprep.subr.bf16.mxu0 %v544_v0  ;;  %v454_v45 = vpack.c.bf16 %v54_v44, %v53_v43  ;;  %v370_v2 = vld [vmem:[#allocation5 + $0x83] ss:$0 sm:$0xff]  ;;  %v371_v4 = vld [vmem:[#allocation5 + $0x86] ss:$0 sm:$0xff]  ;;  %p520_p6 = pnand %p519_p5, %p513_p2 }
  0x2f   :  { %438 = vmatprep.subr.bf16.mxu1 %v544_v0 }
  0x31   :  { %400 = vmatmul.mubr.msk.f32.vlgmr.msra.gmra.mrb[0].mxu1 %vm66_vm1, %v38_v8  ;;  %449 = vmatpush3.bf16.msra.mxu0 %v448_v30 }
  0x32   :  { %410 = vmatprep.mubr.msk.f32.mxu1 %vm545_vm0, %v546_v1  ;;  %440 = vmatpush3.bf16.msra.mxu1 %v439_v21 }
  0x33   :  { %441 = vmatprep.subr.bf16.mxu1 %v544_v0  ;;  %450 = vmatprep.subr.bf16.mxu0 %v544_v0 }
  0x35   :  { %452 = vmatpush3.bf16.msra.mxu0 %v451_v33 }
  0x36   :  { %443 = vmatpush3.bf16.msra.mxu1 %v442_v24  ;;  %453 = vmatprep.subr.bf16.mxu0 %v544_v0 }
  0x39   :  { %455 = vmatpush3.bf16.msra.mxu0 %v454_v45 }
 0x104   :  { %v136_v10 = vpop.f32.mrb[0].mxu1 }
 0x105   :  { %v137_v11 = vadd.f32 %v362_v9, %v136_v10  ;;  %v401_v12 = vpop.f32.mrb[1].mxu1 }
 0x107   :  { %v140_v13 = vsel %vm66_vm1, %v137_v11, 0.0 }
 0x108   :  { %141 = vadd.xlane.f32.xlu0 %v140_v13 }
 0x195   :  { %v142_v14 = vpop.xlane.xlu0 %141 }
 0x196   :  { %v144_v15 = vmul.f32 0.03125, %v142_v14 }
 0x198   :  { %v145_v16 = vsub.f32 %v137_v11, %v144_v15 }
 0x19a   :  { %v146_v17 = vmul.f32 %v145_v16, %v145_v16 }
 0x19c   :  { %v147_v18 = vsel %vm66_vm1, %v146_v17, 0.0 }
 0x19d   :  { %148 = vadd.xlane.f32.xlu0 %v147_v18 }
 0x22a   :  { %v149_v34 = vpop.xlane.xlu0 %148 }
 0x22b   :  { %v150_v35 = vmul.f32 0.03125, %v149_v34 }
 0x22d   :  { %v151_v36 = vadd.f32 1e-05, %v150_v35 }
 0x22f   :  { %464 = vrsqrt.f32 %v151_v36 }
 0x239   :  { %v465_v37 = vpop.eup %464 }
 0x23a   :  { %v153_v39 = vmul.f32 %v465_v37, %v145_v16 }
 0x23c   :  { %v158_v41 = vmul.f32 %v364_v38, %v153_v39 }
 0x23e   :  { %v163_v42 = vadd.f32 %v365_v40, %v158_v41 }
 0x240   :  { %411 = vmatmul.mubr.msk.f32.vlgmr.msra.gmra.mrb[2].mxu1 %vm66_vm1, %v163_v42 }
 0x313   :  { %v237_v47 = vpop.f32.mrb[2].mxu1 }
 0x314   :  { %v238_v48 = vadd.f32 %v366_v46, %v237_v47  ;;  %v412_v49 = vpop.f32.mrb[3].mxu1 }
 0x316   :  { %v241_v50 = vmax.f32 %v238_v48, 0.0 }
 0x318   :  { %430 = vmatmul.mubr.msk.f32.vlgmr.msra.gmra.mrb[0].mxu0 %vm242_vm2, %v241_v50 }
 0x3eb   :  { %v312_v51 = vpop.f32.mrb[0].mxu0 }
 0x3ec   :  { %v316_v53 = vadd.f32 %v312_v51, %v163_v42  ;;  %v431_v54 = vpop.f32.mrb[1].mxu0 }
 0x3ee   :  { %v321_v55 = vadd.f32 %v369_v52, %v316_v53 }
 0x3f0   :  { %v322_v56 = vsel %vm66_vm1, %v321_v55, 0.0 }
 0x3f1   :  { %323 = vadd.xlane.f32.xlu1 %v322_v56 }
 0x47e   :  { %v324_v57 = vpop.xlane.xlu1 %323 }
 0x47f   :  { %v325_v58 = vmul.f32 0.03125, %v324_v57 }
 0x481   :  { %v326_v59 = vsub.f32 %v321_v55, %v325_v58 }
 0x483   :  { %v327_v60 = vmul.f32 %v326_v59, %v326_v59 }
 0x485   :  { %v328_v61 = vsel %vm66_vm1, %v327_v60, 0.0 }
 0x486   :  { %329 = vadd.xlane.f32.xlu1 %v328_v61 }
 0x513   :  { %v330_v62 = vpop.xlane.xlu1 %329 }
 0x514   :  { %v331_v63 = vmul.f32 0.03125, %v330_v62 }
 0x516   :  { %v332_v0 = vadd.f32 1e-05, %v331_v63 }
 0x518   :  { %466 = vrsqrt.f32 %v332_v0 }
 0x522   :  { %v467_v1 = vpop.eup %466 }
 0x523   :  { %v334_v3 = vmul.f32 %v467_v1, %v326_v59 }
 0x525   :  { %v339_v5 = vmul.f32 %v370_v2, %v334_v3 }
 0x527   :  { %v344_v6 = vadd.f32 %v371_v4, %v339_v5 }
 0x529   :  { %345 = vst.msk [vmem:[#allocation7] sm:$0xff] %vm66_vm1, %v344_v6 }
 0x52a   :  { %523 = shalt.err (!%p520_p6)
}
 0x52b   :  { %s524_s10 = scalar_lea.hbm %s618_s2, 128 }
 0x52c   :  { %p525_p7 = scmp.ne.s32.totalorder %s618_s2, %s524_s10  ;;  %p528_p8 = scmp.lt.u32.totalorder %s524_s10, %s618_s2 }
 0x52e   :  { %p530_p9 = pnand %p528_p8, %p525_p7 }
 0x530   :  { %533 = shalt.err (!%p530_p9)
}
 0x531   :  { %355 = dma.vmem_to_hbm [thread:$0]  %s353_s6, 128, %s618_s2, [#allocation4]  }
 0x532   :  { %538 = dma.done.wait [#allocation4], 128  }
 0x533   :  { %539 = vsyncadd [#allocation4], 4294967168 }
 0x534   :  { %359 = vsyncpa [#allocation3], 1 }
 0x535   :  { %360 = vsyncpa [#allocation6], 1 }
 0x536   :  { %361 = vsyncpa [#allocation4], 1 }

</bundles_post_ra>
